<compile_context>
chip_gen: v6e
topology: v6e:2x2x1
jax: 0.10.0
libtpu: 0.0.40
codegen_flags: <defaults>
</compile_context>

<pallas_src>
import functools

import jax
import jax.numpy as jnp
from jax import lax
from jax.experimental import pallas as pl
from jax.experimental.pallas import tpu as pltpu

TEMPERATURE = 0.1
INV_T = 1.0 / TEMPERATURE
COS_EPS = 1e-8          # PyTorch nn.CosineSimilarity eps (clamps the norm product)
ROW_EPS = 1e-4          # sqrt(COS_EPS): per-row clamp used with pre-normalization


def _row_normalize(z):
    """Normalize rows to unit L2 norm (clamped); keep bf16 operands bf16 for the MXU."""
    zf = z.astype(jnp.float32)
    sq = jnp.sum(zf * zf, axis=-1, keepdims=True)                 # (rows, 1) f32
    inv = lax.rsqrt(jnp.maximum(sq, ROW_EPS * ROW_EPS))           # 1 / max(||z||, eps)
    zn = zf * inv
    if z.dtype == jnp.bfloat16:
        zn = zn.astype(jnp.bfloat16)
    return zn


def _make_kernel(has_z3):
    def kernel(*refs):
        if has_z3:
            z1_ref, z2_ref, z3_ref, out_ref, acc_ref = refs
        else:
            z1_ref, z2_ref, out_ref, acc_ref = refs
            z3_ref = None

        i = pl.program_id(0)
        tm = z1_ref.shape[0]          # z1 row-tile size
        batch = z2_ref.shape[0]       # total batch (z2/z3 are resident full arrays)

        @pl.when(i == 0)
        def _init():
            acc_ref[...] = jnp.zeros_like(acc_ref)

        z1n = _row_normalize(z1_ref[...])                         # (tm, D)
        z2n = _row_normalize(z2_ref[...])                         # (B,  D)

        # Positive pairs: the z2 rows aligned with this z1 tile (row-wise dot,
        # no (B,B) diagonal extraction).
        row0 = pl.multiple_of(i * tm, tm)
        z2_pos = _row_normalize(z2_ref[pl.ds(row0, tm), :])       # (tm, D)
        pos = jnp.sum(z1n.astype(jnp.float32) * z2_pos.astype(jnp.float32),
                      axis=-1, keepdims=True) * INV_T             # (tm, 1) = s_ii

        # A · Bᵀ without an explicit transpose: contract last dims of both.
        dims = (((1,), (1,)), ((), ()))
        s12 = lax.dot_general(z1n, z2n, dims,
                              preferred_element_type=jnp.float32) * INV_T   # (tm, B)
        m = jnp.max(s12, axis=-1, keepdims=True)                  # row max for stable exp
        if z3_ref is not None:
            z3n = _row_normalize(z3_ref[...])
            s13 = lax.dot_general(z1n, z3n, dims,
                                  preferred_element_type=jnp.float32) * INV_T
            m = jnp.maximum(m, jnp.max(s13, axis=-1, keepdims=True))
            den = (jnp.sum(jnp.exp(s12 - m), axis=-1, keepdims=True)
                   + jnp.sum(jnp.exp(s13 - m), axis=-1, keepdims=True))
        else:
            den = jnp.sum(jnp.exp(s12 - m), axis=-1, keepdims=True)

        log_den = m + jnp.log(den)                                # (tm, 1)

        # loss_i = -(s_ii - log(denom_i));  accumulate the sum over this tile.
        acc_ref[...] += jnp.sum(pos - log_den)

        @pl.when(i == pl.num_programs(0) - 1)
        def _finalize():
            out_ref[...] = -acc_ref[...] / batch

    return kernel


def _pick_tm(batch):
    """Largest 8-aligned row-tile dividing the batch; fall back to the full batch."""
    for tm in (512, 256, 128, 64, 32, 16, 8):
        if batch % tm == 0:
            return tm
    return batch  # full-extent block is always a legal block shape


@functools.partial(jax.jit, static_argnames=("has_z3",))
def _call(z1, z2, z3, has_z3):
    B, D = z1.shape
    tm = _pick_tm(B)
    num_tiles = B // tm
    n_sim = 2 if has_z3 else 1
    itemsize = jnp.dtype(z1.dtype).itemsize

    in_specs = [
        pl.BlockSpec((tm, D), lambda i: (i, 0)),   # z1: row tiles (pipelined)
        pl.BlockSpec((B, D), lambda i: (0, 0)),    # z2: VMEM-resident
    ]
    args = [z1, z2]
    if has_z3:
        in_specs.append(pl.BlockSpec((B, D), lambda i: (0, 0)))   # z3: VMEM-resident
        args.append(z3)

    grid_spec = pltpu.PrefetchScalarGridSpec(
        num_scalar_prefetch=0,
        grid=(num_tiles,),
        in_specs=in_specs,
        out_specs=pl.BlockSpec((1, 1), lambda i: (0, 0)),
        scratch_shapes=[pltpu.VMEM((1, 1), jnp.float32)],
    )

    out = pl.pallas_call(
        _make_kernel(has_z3),
        out_shape=jax.ShapeDtypeStruct((1, 1), jnp.float32),
        grid_spec=grid_spec,
        # The row axis carries the scalar accumulator -> "arbitrary".
        # TODO(synk): per-tile partial outputs would allow "parallel" (v7x megacore).
        compiler_params=pltpu.CompilerParams(
            dimension_semantics=("arbitrary",),
            vmem_limit_bytes=32 * 1024 * 1024,
        ),
        cost_estimate=pl.CostEstimate(
            flops=2 * B * B * D * n_sim,
            transcendentals=B * B * n_sim + 2 * B,
            bytes_accessed=(n_sim + 1) * B * D * itemsize + 4,
        ),
    )(*args)
    return out[0, 0]


def supervised_contrastive_loss(z1, z2, z3=None):
    """Pallas TPU implementation of SupervisedContrastiveLoss.forward."""
    return _call(z1, z2, z3, z3 is not None)


def _reference(z1, z2, z3=None):
    """Pure-JAX reference mirroring the PyTorch module."""
    z1 = z1.astype(jnp.float32)
    z2 = z2.astype(jnp.float32)

    def cos_mat(a, b):
        an = jnp.sqrt(jnp.sum(a * a, axis=-1, keepdims=True))
        bn = jnp.sqrt(jnp.sum(b * b, axis=-1, keepdims=True))
        return (a @ b.T) / jnp.maximum(an * bn.T, COS_EPS)

    s12 = cos_mat(z1, z2) / TEMPERATURE
    num = jnp.exp(jnp.diagonal(s12))
    denom = jnp.sum(jnp.exp(s12), axis=1)
    if z3 is not None:
        z3 = z3.astype(jnp.float32)
        s13 = cos_mat(z1, z3) / TEMPERATURE
        denom = denom + jnp.sum(jnp.exp(s13), axis=1)
    return -jnp.mean(jnp.log(num / denom))


if __name__ == "__main__":
    B, D = 8, 32
    key = jax.random.PRNGKey(0)
    k1, k2, k3 = jax.random.split(key, 3)
    z1 = jax.random.normal(k1, (B, D), dtype=jnp.float32)
    z2 = jax.random.normal(k2, (B, D), dtype=jnp.float32)
    z3 = jax.random.normal(k3, (B, D), dtype=jnp.float32)

    # With z3
    loss3 = supervised_contrastive_loss(z1, z2, z3)
    jax.block_until_ready(loss3)
    ref3 = _reference(z1, z2, z3)

    # Without z3
    loss2 = supervised_contrastive_loss(z1, z2)
    jax.block_until_ready(loss2)
    ref2 = _reference(z1, z2)

    assert jnp.allclose(loss3, ref3, rtol=1e-4, atol=1e-4), (loss3, ref3)
    assert jnp.allclose(loss2, ref2, rtol=1e-4, atol=1e-4), (loss2, ref2)
    print("KERNEL_OK")
</pallas_src>

<mosaic_0001>
module attributes {stable_mosaic.version = 11 : i64} {
  func.func @kernel(%arg0: i32, %arg1: memref<8x32xf32, #tpu.memory_space<vmem>>, %arg2: memref<8x32xf32, #tpu.memory_space<vmem>>, %arg3: memref<8x32xf32, #tpu.memory_space<vmem>>, %arg4: memref<1x1xf32, #tpu.memory_space<vmem>>, %arg5: memref<1x1xf32, #tpu.memory_space<vmem>>) attributes {dimension_semantics = [#tpu.dimension_semantics<arbitrary>], iteration_bounds = array<i64: 1>, scalar_prefetch = 0 : i64, scratch_operands = 1 : i64, tpu.core_type = #tpu.core_type<tc>, window_params = [{transform_indices = @transform_0, window_bounds = array<i64: 8, 32>}, {pipeline_mode = #tpu.pipeline_mode<synchronous>, transform_indices = @transform_1, window_bounds = array<i64: 8, 32>}, {pipeline_mode = #tpu.pipeline_mode<synchronous>, transform_indices = @transform_2, window_bounds = array<i64: 8, 32>}, {pipeline_mode = #tpu.pipeline_mode<synchronous>, transform_indices = @transform_3, window_bounds = array<i64: 1, 1>}]} {
    %c0_i32 = arith.constant 0 : i32
    %0 = arith.cmpi eq, %arg0, %c0_i32 : i32
    %1 = arith.extui %0 : i1 to i32
    %c0_i32_0 = arith.constant 0 : i32
    %2 = arith.cmpi ne, %1, %c0_i32_0 : i32
    scf.if %2 {
      %cst_31 = arith.constant 0.000000e+00 : f32
      %83 = vector.broadcast %cst_31 : f32 to vector<1x1xf32>
      %c0_32 = arith.constant 0 : index
      %c0_33 = arith.constant 0 : index
      %84 = vector.load %arg5[%c0_32, %c0_33] : memref<1x1xf32, #tpu.memory_space<vmem>>, vector<1x1xf32>
      tpu.vector_store %arg5[%c0_32, %c0_33], %83 {strides = array<i32>} : memref<1x1xf32, #tpu.memory_space<vmem>>, vector<1x1xf32>,
    } else {
    }
    %c0 = arith.constant 0 : index
    %c0_1 = arith.constant 0 : index
    %3 = vector.load %arg1[%c0, %c0_1] : memref<8x32xf32, #tpu.memory_space<vmem>>, vector<8x32xf32>
    %4 = arith.mulf %3, %3 : vector<8x32xf32>
    %cst = arith.constant dense<0.000000e+00> : vector<8xf32>
    %5 = vector.multi_reduction <add>, %4, %cst [1] : vector<8x32xf32> to vector<8xf32>
    %6 = vector.shape_cast %5 : vector<8xf32> to vector<8x1xf32>
    %cst_2 = arith.constant 9.99999993E-9 : f32
    %7 = vector.broadcast %cst_2 : f32 to vector<8x1xf32>
    %8 = arith.maximumf %6, %7 : vector<8x1xf32>
    %9 = math.rsqrt %8 : vector<8x1xf32>
    %10 = vector.broadcast %9 : vector<8x1xf32> to vector<8x32xf32>
    %11 = arith.mulf %3, %10 : vector<8x32xf32>
    %c0_3 = arith.constant 0 : index
    %c0_4 = arith.constant 0 : index
    %12 = vector.load %arg2[%c0_3, %c0_4] : memref<8x32xf32, #tpu.memory_space<vmem>>, vector<8x32xf32>
    %13 = arith.mulf %12, %12 : vector<8x32xf32>
    %cst_5 = arith.constant dense<0.000000e+00> : vector<8xf32>
    %14 = vector.multi_reduction <add>, %13, %cst_5 [1] : vector<8x32xf32> to vector<8xf32>
    %15 = vector.shape_cast %14 : vector<8xf32> to vector<8x1xf32>
    %cst_6 = arith.constant 9.99999993E-9 : f32
    %16 = vector.broadcast %cst_6 : f32 to vector<8x1xf32>
    %17 = arith.maximumf %15, %16 : vector<8x1xf32>
    %18 = math.rsqrt %17 : vector<8x1xf32>
    %19 = vector.broadcast %18 : vector<8x1xf32> to vector<8x32xf32>
    %20 = arith.mulf %12, %19 : vector<8x32xf32>
    %c8_i32 = arith.constant 8 : i32
    %21 = arith.muli %arg0, %c8_i32 : i32
    %22 = tpu.assume_multiple %21, 8 : i32
    %23 = arith.index_cast %22 : i32 to index
    %c0_7 = arith.constant 0 : index
    %24 = vector.load %arg2[%23, %c0_7] : memref<8x32xf32, #tpu.memory_space<vmem>>, vector<8x32xf32>
    %25 = arith.mulf %24, %24 : vector<8x32xf32>
    %cst_8 = arith.constant dense<0.000000e+00> : vector<8xf32>
    %26 = vector.multi_reduction <add>, %25, %cst_8 [1] : vector<8x32xf32> to vector<8xf32>
    %27 = vector.shape_cast %26 : vector<8xf32> to vector<8x1xf32>
    %cst_9 = arith.constant 9.99999993E-9 : f32
    %28 = vector.broadcast %cst_9 : f32 to vector<8x1xf32>
    %29 = arith.maximumf %27, %28 : vector<8x1xf32>
    %30 = math.rsqrt %29 : vector<8x1xf32>
    %31 = vector.broadcast %30 : vector<8x1xf32> to vector<8x32xf32>
    %32 = arith.mulf %24, %31 : vector<8x32xf32>
    %33 = arith.mulf %11, %32 : vector<8x32xf32>
    %cst_10 = arith.constant dense<0.000000e+00> : vector<8xf32>
    %34 = vector.multi_reduction <add>, %33, %cst_10 [1] : vector<8x32xf32> to vector<8xf32>
    %35 = vector.shape_cast %34 : vector<8xf32> to vector<8x1xf32>
    %cst_11 = arith.constant 1.000000e+01 : f32
    %36 = vector.broadcast %cst_11 : f32 to vector<8x1xf32>
    %37 = arith.mulf %35, %36 : vector<8x1xf32>
    %cst_12 = arith.constant dense<0.000000e+00> : vector<8x8xf32>
    %38 = tpu.matmul %11, %20, %cst_12 {dimension_numbers = #tpu.dot_dimension_numbers<[1], [1], [0], [0], [0, 0, 1, 0], [], []>} : vector<8x32xf32>, vector<8x32xf32>, vector<8x8xf32> -> vector<8x8xf32>
    %cst_13 = arith.constant 1.000000e+01 : f32
    %39 = vector.broadcast %cst_13 : f32 to vector<8x8xf32>
    %40 = arith.mulf %38, %39 : vector<8x8xf32>
    %cst_14 = arith.constant dense<0xFF800000> : vector<8xf32>
    %41 = vector.multi_reduction <maximumf>, %40, %cst_14 [1] : vector<8x8xf32> to vector<8xf32>
    %42 = vector.shape_cast %41 : vector<8xf32> to vector<8x1xf32>
    %c0_15 = arith.constant 0 : index
    %c0_16 = arith.constant 0 : index
    %43 = vector.load %arg3[%c0_15, %c0_16] : memref<8x32xf32, #tpu.memory_space<vmem>>, vector<8x32xf32>
    %44 = arith.mulf %43, %43 : vector<8x32xf32>
    %cst_17 = arith.constant dense<0.000000e+00> : vector<8xf32>
    %45 = vector.multi_reduction <add>, %44, %cst_17 [1] : vector<8x32xf32> to vector<8xf32>
    %46 = vector.shape_cast %45 : vector<8xf32> to vector<8x1xf32>
    %cst_18 = arith.constant 9.99999993E-9 : f32
    %47 = vector.broadcast %cst_18 : f32 to vector<8x1xf32>
    %48 = arith.maximumf %46, %47 : vector<8x1xf32>
    %49 = math.rsqrt %48 : vector<8x1xf32>
    %50 = vector.broadcast %49 : vector<8x1xf32> to vector<8x32xf32>
    %51 = arith.mulf %43, %50 : vector<8x32xf32>
    %cst_19 = arith.constant dense<0.000000e+00> : vector<8x8xf32>
    %52 = tpu.matmul %11, %51, %cst_19 {dimension_numbers = #tpu.dot_dimension_numbers<[1], [1], [0], [0], [0, 0, 1, 0], [], []>} : vector<8x32xf32>, vector<8x32xf32>, vector<8x8xf32> -> vector<8x8xf32>
    %cst_20 = arith.constant 1.000000e+01 : f32
    %53 = vector.broadcast %cst_20 : f32 to vector<8x8xf32>
    %54 = arith.mulf %52, %53 : vector<8x8xf32>
    %cst_21 = arith.constant dense<0xFF800000> : vector<8xf32>
    %55 = vector.multi_reduction <maximumf>, %54, %cst_21 [1] : vector<8x8xf32> to vector<8xf32>
    %56 = vector.shape_cast %55 : vector<8xf32> to vector<8x1xf32>
    %57 = arith.maximumf %42, %56 : vector<8x1xf32>
    %58 = vector.broadcast %57 : vector<8x1xf32> to vector<8x8xf32>
    %59 = arith.subf %40, %58 : vector<8x8xf32>
    %60 = math.exp %59 : vector<8x8xf32>
    %cst_22 = arith.constant dense<0.000000e+00> : vector<8xf32>
    %61 = vector.multi_reduction <add>, %60, %cst_22 [1] : vector<8x8xf32> to vector<8xf32>
    %62 = vector.shape_cast %61 : vector<8xf32> to vector<8x1xf32>
    %63 = vector.broadcast %57 : vector<8x1xf32> to vector<8x8xf32>
    %64 = arith.subf %54, %63 : vector<8x8xf32>
    %65 = math.exp %64 : vector<8x8xf32>
    %cst_23 = arith.constant dense<0.000000e+00> : vector<8xf32>
    %66 = vector.multi_reduction <add>, %65, %cst_23 [1] : vector<8x8xf32> to vector<8xf32>
    %67 = vector.shape_cast %66 : vector<8xf32> to vector<8x1xf32>
    %68 = arith.addf %62, %67 : vector<8x1xf32>
    %69 = math.log %68 : vector<8x1xf32>
    %70 = arith.addf %57, %69 : vector<8x1xf32>
    %c0_24 = arith.constant 0 : index
    %c0_25 = arith.constant 0 : index
    %71 = vector.load %arg5[%c0_24, %c0_25] : memref<1x1xf32, #tpu.memory_space<vmem>>, vector<1x1xf32>
    %72 = arith.subf %37, %70 : vector<8x1xf32>
    %73 = vector.shape_cast %72 : vector<8x1xf32> to vector<1x8x1xf32>
    %cst_26 = arith.constant dense<0.000000e+00> : vector<1xf32>
    %74 = vector.multi_reduction <add>, %73, %cst_26 [1, 2] : vector<1x8x1xf32> to vector<1xf32>
    %75 = vector.shape_cast %74 : vector<1xf32> to vector<1x1x1xf32>
    %76 = vector.extract %75[0, 0, 0] : f32 from vector<1x1x1xf32>
    %77 = vector.broadcast %76 : f32 to vector<1x1xf32>
    %78 = arith.addf %71, %77 : vector<1x1xf32>
    %c0_27 = arith.constant 0 : index
    %c0_28 = arith.constant 0 : index
    %79 = vector.load %arg5[%c0_27, %c0_28] : memref<1x1xf32, #tpu.memory_space<vmem>>, vector<1x1xf32>
    tpu.vector_store %arg5[%c0_27, %c0_28], %78 {strides = array<i32>} : memref<1x1xf32, #tpu.memory_space<vmem>>, vector<1x1xf32>,
    %c0_i32_29 = arith.constant 0 : i32
    %80 = arith.cmpi eq, %arg0, %c0_i32_29 : i32
    %81 = arith.extui %80 : i1 to i32
    %c0_i32_30 = arith.constant 0 : i32
    %82 = arith.cmpi ne, %81, %c0_i32_30 : i32
    scf.if %82 {
      %c0_31 = arith.constant 0 : index
      %c0_32 = arith.constant 0 : index
      %83 = vector.load %arg5[%c0_31, %c0_32] : memref<1x1xf32, #tpu.memory_space<vmem>>, vector<1x1xf32>
      %cst_33 = arith.constant 0.000000e+00 : f32
      %84 = vector.broadcast %cst_33 : f32 to vector<1x1xf32>
      %85 = arith.subf %84, %83 : vector<1x1xf32>
      %cst_34 = arith.constant 8.000000e+00 : f32
      %86 = vector.broadcast %cst_34 : f32 to vector<1x1xf32>
      %87 = arith.divf %85, %86 : vector<1x1xf32>
      %c0_35 = arith.constant 0 : index
      %c0_36 = arith.constant 0 : index
      %88 = vector.load %arg4[%c0_35, %c0_36] : memref<1x1xf32, #tpu.memory_space<vmem>>, vector<1x1xf32>
      tpu.vector_store %arg4[%c0_35, %c0_36], %87 {strides = array<i32>} : memref<1x1xf32, #tpu.memory_space<vmem>>, vector<1x1xf32>,
    } else {
    }
    return
  }
  func.func @transform_0(%arg0: i32) -> (i32, i32) {
    %c0_i32 = arith.constant 0 : i32
    %c0_i32_0 = arith.constant 0 : i32
    return %arg0, %c0_i32 : i32, i32
  }
  func.func @transform_1(%arg0: i32) -> (i32, i32) {
    %c0_i32 = arith.constant 0 : i32
    %c0_i32_0 = arith.constant 0 : i32
    %c0_i32_1 = arith.constant 0 : i32
    return %c0_i32, %c0_i32_0 : i32, i32
  }
  func.func @transform_2(%arg0: i32) -> (i32, i32) {
    %c0_i32 = arith.constant 0 : i32
    %c0_i32_0 = arith.constant 0 : i32
    %c0_i32_1 = arith.constant 0 : i32
    return %c0_i32, %c0_i32_0 : i32, i32
  }
  func.func @transform_3(%arg0: i32) -> (i32, i32) {
    %c0_i32 = arith.constant 0 : i32
    %c0_i32_0 = arith.constant 0 : i32
    %c0_i32_1 = arith.constant 0 : i32
    return %c0_i32, %c0_i32_0 : i32, i32
  }
}

</mosaic_0001>

<bundles_post_ra>
// kernel: _call.1
= control target key start
LH: loop header
LB: loop body
LE: loop exit
PB: predicated region body
PF: predicated region fallthrough
CT: control target
= control target key end

     0   :  { %8 = vsyncpa [#allocation4], 0  ;;  %s496_s0 = inlined_call_operand.hbm [shape: f32[8,32], index: 0, kind: input, shape index: {}]   ;;  %s497_s1 = inlined_call_operand.hbm [shape: f32[8,32], index: 1, kind: input, shape index: {}]   ;;  %s498_s2 = inlined_call_operand.hbm [shape: f32[8,32], index: 2, kind: input, shape index: {}]   ;;  %s499_s3 = inlined_call_operand.hbm [shape: f32[1,1], index: 3, kind: output, shape index: {}]  }
   0x1   :  { %9 = vsyncpa [#allocation7], 0 }
   0x2   :  { %10 = vsyncpa [#allocation5], 0  ;;  %s438_s12 = smov [#allocation6]   ;;  %s439_s14 = smov [#allocation3]  }
   0x3   :  { %s27_s13 = sshll.u32 %s438_s12, 4  ;;  %s17_s15 = sshll.u32 %s439_s14, 4  ;;  %s28_s13 = int_to_ptr.vmem [resolvable:$true] %s27_s13  ;;  %s18_s15 = int_to_ptr.vmem [resolvable:$true] %s17_s15 }
   0x4   :  { %s360_s16 = scalar_lea.vmem %s28_s13, 128  ;;  %p365_p1 = scmp.lt.s32.totalorder %s28_s13, %s28_s13 }
   0x5   :  { %p361_p0 = scmp.ne.s32.totalorder %s28_s13, %s360_s16  ;;  %p366_p2 = scmp.lt.s32.totalorder %s360_s16, %s360_s16 }
   0x7   :  { %p367_p3 = por %p366_p2, %p365_p1 }
   0x9   :  { %p368_p4 = pnand %p367_p3, %p361_p0 }
   0xb   :  { %371 = shalt.err (!%p368_p4)
}
   0xc   :  { %30 = dma.hbm_to_vmem [thread:$0]  %s497_s1, 128, %s28_s13, [#allocation7]  }
   0xd   :  { %s380_s19 = scalar_lea.vmem %s18_s15, 128  ;;  %p385_p6 = scmp.lt.s32.totalorder %s18_s15, %s18_s15 }
   0xe   :  { %p381_p5 = scmp.ne.s32.totalorder %s18_s15, %s380_s19  ;;  %p386_p7 = scmp.lt.s32.totalorder %s380_s19, %s380_s19 }
  0x10   :  { %p387_p8 = por %p386_p7, %p385_p6 }
  0x12   :  { %p388_p9 = pnand %p387_p8, %p381_p5 }
  0x14   :  { %391 = shalt.err (!%p388_p9)
}
  0x15   :  { %20 = dma.hbm_to_vmem [thread:$0]  %s496_s0, 128, %s18_s15, [#allocation4]  }
  0x16   :  { %s440_s22 = smov [#allocation8]  }
  0x17   :  { %s37_s23 = sshll.u32 %s440_s22, 4  ;;  %s38_s23 = int_to_ptr.vmem [resolvable:$true] %s37_s23 }
  0x18   :  { %s400_s24 = scalar_lea.vmem %s38_s23, 128  ;;  %p405_p11 = scmp.lt.s32.totalorder %s38_s23, %s38_s23 }
  0x19   :  { %p401_p10 = scmp.ne.s32.totalorder %s38_s23, %s400_s24  ;;  %p406_p12 = scmp.lt.s32.totalorder %s400_s24, %s400_s24 }
  0x1b   :  { %p407_p13 = por %p406_p12, %p405_p11 }
  0x1d   :  { %p408_p0 = pnand %p407_p13, %p401_p10 }
  0x1f   :  { %411 = shalt.err (!%p408_p0)
}
  0x20   :  { %40 = dma.hbm_to_vmem [thread:$0]  %s498_s2, 128, %s38_s23, [#allocation7]  }
  0x21   :  { %432 = dma.done.wait [#allocation4], 128  }
  0x22   :  { %433 = vsyncadd [#allocation4], 4294967168 }
  0x23   :  { %434 = dma.done.wait [#allocation7], 256  }
  0x24   :  { %435 = vsyncadd [#allocation7], 4294967040  ;;  %vm58_vm0 = vcmask 261120   ;;  %v65_v0 = vld [vmem:[#allocation6] sm:$0xff]  ;;  %v56_v1 = vld [vmem:[#allocation3] sm:$0xff]  ;;  %v441_v9 = vmov 0.0  }
  0x25   :  { %v169_v2 = vld [vmem:[#allocation8] sm:$0xff]  ;;  %v66_v3 = vmul.f32 %v65_v0, %v65_v0  ;;  %v57_v4 = vmul.f32 %v56_v1, %v56_v1  ;;  %320 = vmatprep.subr.mxu0 %v441_v9  ;;  %325 = vmatprep.subr.mxu1 %v441_v9  ;;  %vm442_vm1 = vmmov 0   ;;  %vm165_vm2 = vcmask 64512   ;;  %s443_s2 = smov [#allocation9]  }
  0x26   :  { %v170_v5 = vmul.f32 %v169_v2, %v169_v2  ;;  %322 = vmatprep.mubr.msk.f32.mxu0 %vm442_vm1, %v441_v9  ;;  %327 = vmatprep.mubr.msk.f32.mxu1 %vm442_vm1, %v441_v9  ;;  %vm273_vm3 = vcmask 7168   ;;  %vm54_vm4 = vcmask 0   ;;  %s302_s26 = sshll.u32 %s443_s2, 4  ;;  %s303_s26 = int_to_ptr.vmem [resolvable:$true] %s302_s26 }
  0x27   :  { %v67_v6 = vsel %vm58_vm0, %v66_v3, 0.0  ;;  %v59_v7 = vsel %vm58_vm0, %v57_v4, 0.0  ;;  %55 = vst.msk [vmem:[#allocation2] sm:$0x1] %vm54_vm4, %v441_v9  ;;  %s412_s27 = scalar_lea.vmem %s303_s26, 16  ;;  %s416_s28 = scalar_lea.vmem %s303_s26, 32 }
  0x28   :  { %68 = vadd.xlane.f32.xlu0 %v67_v6  ;;  %60 = vadd.xlane.f32.xlu1 %v59_v7  ;;  %v171_v8 = vsel %vm58_vm0, %v170_v5, 0.0  ;;  %p413_p1 = scmp.ne.s32.totalorder %s303_s26, %s412_s27  ;;  %p417_p2 = scmp.lt.s32.totalorder %s303_s26, %s303_s26 }
  0x29   :  { %p418_p3 = scmp.lt.s32.totalorder %s416_s28, %s412_s27 }
  0x2b   :  { %p419_p4 = por %p418_p3, %p417_p2 }
  0x2c   :  { %172 = vadd.xlane.f32.xlu0 %v171_v8 }
  0x2d   :  { %p420_p5 = pnand %p419_p4, %p413_p1 }
  0xb1   :  { %v69_v10 = vpop.xlane.xlu0 %68  ;;  %v61_v11 = vpop.xlane.xlu1 %60 }
  0xb2   :  { %v70_v12 = vmax.f32 %v69_v10, 1e-08  ;;  %v62_v13 = vmax.f32 %v61_v11, 1e-08 }
  0xb4   :  { %338 = vrsqrt.f32 %v70_v12 }
  0xb5   :  { %340 = vrsqrt.f32 %v62_v13  ;;  %v173_v14 = vpop.xlane.xlu0 %172 }
  0xb6   :  { %v174_v15 = vmax.f32 %v173_v14, 1e-08 }
  0xb8   :  { %342 = vrsqrt.f32 %v174_v15 }
  0xc1   :  { %v339_v16 = vpop.eup %338 }
  0xc2   :  { %v341_v17 = vpop.eup %340  ;;  %v72_v18 = vmul.f32 %v339_v16, %v65_v0 }
  0xc3   :  { %v64_v19 = vmul.f32 %v341_v17, %v56_v1 }
  0xc4   :  { %321 = vmatpush3.xpose.msk.msra.mxu0 %vm58_vm0, %v72_v18 }
  0xc5   :  { %v343_v20 = vpop.eup %342 }
  0xc6   :  { %v176_v21 = vmul.f32 %v343_v20, %v169_v2 }
  0xc7   :  { %323 = vmatmul.mubr.msk.f32.vlgmr.msra.gmra.mxu0 %vm58_vm0, %v64_v19 }
  0xc8   :  { %326 = vmatpush3.xpose.msk.msra.mxu1 %vm58_vm0, %v176_v21 }
  0xcb   :  { %328 = vmatmul.mubr.msk.f32.vlgmr.msra.gmra.mxu1 %vm58_vm0, %v64_v19 }
 0x187   :  { %v160_v22 = vpop.f32.mrf.mxu0 }
 0x188   :  { %v164_v23 = vmul.f32 10.0, %v160_v22 }
 0x189   :  { %v324_v24 = vpop.f32.mrf.mxu0 }
 0x18a   :  { %v166_v25 = vsel %vm165_vm2, %v164_v23, -inf }
 0x18b   :  { %v246_v26 = vpop.f32.mrf.mxu1  ;;  %167 = vmax.xlane.f32.xlu1 %v166_v25 }
 0x18c   :  { %v250_v27 = vmul.f32 10.0, %v246_v26 }
 0x18d   :  { %v329_v28 = vpop.f32.mrf.mxu1 }
 0x18e   :  { %v251_v29 = vsel %vm165_vm2, %v250_v27, -inf }
 0x18f   :  { %252 = vmax.xlane.f32.xlu0 %v251_v29  ;;  %78 = vadd.xlane.f32.xlu1 %v67_v6 }
 0x214   :  { %v168_v30 = vpop.xlane.xlu1 %167 }
 0x218   :  { %v253_v31 = vpop.xlane.xlu0 %252  ;;  %v79_v32 = vpop.xlane.xlu1 %78 }
 0x219   :  { %v254_v33 = vmax.f32 %v168_v30, %v253_v31  ;;  %v80_v34 = vmax.f32 %v79_v32, 1e-08 }
 0x21b   :  { %v255_v35 = vsub.f32 %v164_v23, %v254_v33  ;;  %v261_v36 = vsub.f32 %v250_v27, %v254_v33  ;;  %344 = vrsqrt.f32 %v80_v34 }
 0x21d   :  { %v256_v37 = vmul.f32 1.442695, %v255_v35  ;;  %v262_v38 = vmul.f32 1.442695, %v261_v36 }
 0x21f   :  { %346 = vpow2.f32 %v256_v37 }
 0x220   :  { %348 = vpow2.f32 %v262_v38 }
 0x228   :  { %v345_v39 = vpop.eup %344 }
 0x229   :  { %v82_v40 = vmul.f32 %v345_v39, %v65_v0  ;;  %v271_v0 = vld [vmem:[#allocation2] sm:$0x1] }
 0x22b   :  { %v83_v44 = vmul.f32 %v82_v40, %v64_v19 }
 0x22c   :  { %v347_v41 = vpop.eup %346 }
 0x22d   :  { %v349_v42 = vpop.eup %348  ;;  %v258_v43 = vsel %vm165_vm2, %v347_v41, 0.0  ;;  %v84_v46 = vsel %vm58_vm0, %v83_v44, 0.0 }
 0x22e   :  { %v264_v45 = vsel %vm165_vm2, %v349_v42, 0.0  ;;  %259 = vadd.xlane.f32.xlu0 %v258_v43 }
 0x22f   :  { %265 = vadd.xlane.f32.xlu1 %v264_v45 }
 0x232   :  { %85 = vadd.xlane.f32.xlu0 %v84_v46 }
 0x2b7   :  { %v260_v47 = vpop.xlane.xlu0 %259 }
 0x2b8   :  { %v266_v48 = vpop.xlane.xlu1 %265 }
 0x2b9   :  { %v267_v49 = vadd.f32 %v266_v48, %v260_v47 }
 0x2bb   :  { %350 = vlog2.f32 %v267_v49  ;;  %v86_v51 = vpop.xlane.xlu0 %85 }
 0x2bc   :  { %v87_v53 = vmul.f32 10.0, %v86_v51 }
 0x2c8   :  { %v351_v50 = vpop.eup %350 }
 0x2c9   :  { %v269_v52 = vmul.f32 0.6931472, %v351_v50 }
 0x2cb   :  { %v270_v54 = vadd.f32 %v269_v52, %v254_v33 }
 0x2cd   :  { %v272_v55 = vsub.f32 %v87_v53, %v270_v54 }
 0x2cf   :  { %v274_v56 = vsel %vm273_vm3, %v272_v55, 0.0 }
 0x2d0   :  { %275 = vadd.xlane.f32.xlu1 %v274_v56 }
 0x359   :  { %v276_v57 = vpop.xlane.xlu1 %275 }
 0x35a   :  { %v277_v58 = vrot.slane %v276_v57, 4 }
 0x35c   :  { %v278_v59 = vadd.f32 %v277_v58, %v276_v57 }
 0x35e   :  { %v279_v60 = vrot.slane %v278_v59, 2 }
 0x360   :  { %v280_v61 = vadd.f32 %v279_v60, %v278_v59 }
 0x362   :  { %v281_v62 = vrot.slane %v280_v61, 1 }
 0x364   :  { %v282_v63 = vadd.f32 %v281_v62, %v280_v61 }
 0x366   :  { %330 = vpush %v282_v63 }
 0x397   :  { %s331_s0 = spop %330 }
 0x398   :  { %v284_v1 = vstv %s331_s0 }
 0x399   :  { %v285_v2 = vadd.f32 %v284_v1, %v271_v0 }
 0x39b   :  { %287 = vst.msk [vmem:[#allocation2] sm:$0x1] %vm54_vm4, %v285_v2 }
 0x3a2   :  { %v291_v3 = vld [vmem:[#allocation2] sm:$0x1] }
 0x3a3   :  { %v292_v4 = vsub.f32 0.0, %v291_v3 }
 0x3a5   :  { %v294_v5 = vmul.f32 0.125, %v292_v4 }
 0x3a7   :  { %295 = vst.msk [vmem:[#allocation9] sm:$0x1] %vm54_vm4, %v294_v5 }
 0x3a8   :  { %423 = shalt.err (!%p420_p5)
}
 0x3a9   :  { %305 = dma.vmem_to_hbm [thread:$0]  %s303_s26, 16, %s499_s3, [#allocation5]  }
 0x3aa   :  { %436 = dma.done.wait [#allocation5], 16  }
 0x3ab   :  { %437 = vsyncadd [#allocation5], 4294967280 }
 0x3ac   :  { %309 = vsyncpa [#allocation4], 1 }
 0x3ad   :  { %310 = vsyncpa [#allocation7], 1 }
 0x3ae   :  { %311 = vsyncpa [#allocation5], 1 }

</bundles_post_ra>
